<compile_context>
chip_gen: v7x
topology: tpu7x:2x2x1
jax: 0.10.0
libtpu: 0.0.40
codegen_flags: <defaults>
</compile_context>

<pallas_src>
import functools

import jax
import jax.numpy as jnp
from jax.experimental import pallas as pl
from jax.experimental.pallas import tpu as pltpu


def _smask_kernel(x_ref, noisy_ref, o_ref):
    # Whole-tile elementwise hot path: sigmoid (EUP) + mul (VPU). Both units
    # have enormous slack — DMA bandwidth is the binding resource.
    x = x_ref[...].astype(jnp.float32)
    n = noisy_ref[...].astype(jnp.float32)
    o_ref[...] = (jax.nn.sigmoid(x) * n).astype(o_ref.dtype)


def _sublane_tile(*dtypes) -> int:
    """Native packed sublane tile for the narrowest dtype involved."""
    min_isz = min(jnp.dtype(d).itemsize for d in dtypes)
    return 8 * max(1, 4 // int(min_isz))


def _smask_pallas_2d(x2, n2, out_dtype, target_block_bytes, vmem_budget_bytes):
    """Run the kernel on a lane-dense [rows, lanes] slab (lanes % 128 == 0)."""
    rows, lanes = x2.shape
    isz_x = jnp.dtype(x2.dtype).itemsize
    isz_n = jnp.dtype(n2.dtype).itemsize
    isz_o = jnp.dtype(out_dtype).itemsize
    max_isz = max(isz_x, isz_n, isz_o)     # size blocks at the widest dtype
    sum_isz = isz_x + isz_n + isz_o        # true per-element pipeline bytes
    tile = _sublane_tile(x2.dtype, n2.dtype, out_dtype)

    # Rows per block from the ~per-input byte target, clamped so the full
    # pipeline footprint (2 buffers x 3 arrays) stays inside the VMEM budget.
    br = int(target_block_bytes) // (lanes * max_isz)
    br_budget = int(vmem_budget_bytes) // (2 * lanes * sum_isz)
    br = min(br, max(br_budget, 1))
    br = (br // tile) * tile
    br = max(br, tile)

    if br >= rows:
        # Whole slab fits in one block: split into >=2 blocks when possible so
        # ("parallel",) shards the grid across both TensorCores on v7x.
        half = -(-rows // 2)
        half = -(-half // tile) * tile
        br = half if half < rows else rows

    grid = (pl.cdiv(rows, br),)

    # Explicit scoped-VMEM limit sized to the real footprint (+ headroom),
    # kept well under v7x's 64 MiB physical VMEM.
    footprint = 2 * br * lanes * sum_isz
    vmem_limit = int(min(max(footprint + (4 << 20), 16 << 20), 56 << 20))

    # Alias the output onto whichever input shares its dtype (shape already
    # matches). Memory-footprint win; HBM traffic is unchanged.
    if x2.dtype == out_dtype:
        io_aliases = {0: 0}
    elif n2.dtype == out_dtype:
        io_aliases = {1: 0}
    else:
        io_aliases = {}

    return pl.pallas_call(
        _smask_kernel,
        out_shape=jax.ShapeDtypeStruct((rows, lanes), out_dtype),
        grid_spec=pl.GridSpec(
            grid=grid,
            in_specs=[
                pl.BlockSpec((br, lanes), lambda i: (i, 0)),
                pl.BlockSpec((br, lanes), lambda i: (i, 0)),
            ],
            out_specs=pl.BlockSpec((br, lanes), lambda i: (i, 0)),
        ),
        compiler_params=pltpu.CompilerParams(
            dimension_semantics=("parallel",),
            vmem_limit_bytes=vmem_limit,
        ),
        input_output_aliases=io_aliases,
    )(x2, n2)


def smask(
    x: jax.Array,
    noisy: jax.Array,
    *,
    target_block_bytes: int = 4 << 20,   # ~4 MiB per input block per grid step
    vmem_budget_bytes: int = 40 << 20,   # cap on the double-buffered footprint
    min_pallas_bytes: int = 1 << 20,     # below this, fused XLA elementwise wins
) -> jax.Array:
    """sigmoid(x) * noisy, elementwise. x and noisy must have identical shapes."""
    assert x.shape == noisy.shape, (x.shape, noisy.shape)
    out_dtype = jnp.result_type(x.dtype, noisy.dtype)
    total = x.size
    nbytes = total * jnp.dtype(out_dtype).itemsize

    def _jax_ref(a, b):
        return (jax.nn.sigmoid(a.astype(jnp.float32)) * b.astype(jnp.float32)).astype(out_dtype)

    # Fused XLA elementwise is already at the same 3-pass HBM roofline, so it
    # is the right path for tiny inputs (pallas_call dispatch overhead) and
    # for ragged flat sizes (total % 128 != 0) — no extra padding/concat pass.
    if total == 0 or nbytes < min_pallas_bytes or total % 128 != 0:
        return _jax_ref(x, noisy)

    # Free reshapes of contiguous buffers: fold into a lane-dense 2-D slab.
    # Prefer the widest 128-multiple lane fold that still leaves >= 8 rows.
    divisors = [l for l in (1024, 512, 256, 128) if total % l == 0]
    lanes = next((l for l in divisors if total // l >= 8), 128)
    rows = total // lanes

    x2 = x.reshape(rows, lanes)
    n2 = noisy.reshape(rows, lanes)
    out2 = _smask_pallas_2d(x2, n2, out_dtype, target_block_bytes, vmem_budget_bytes)
    return out2.reshape(x.shape)


if __name__ == "__main__":
    key = jax.random.PRNGKey(0)

    def run_case(idx, shape, x_dtype=jnp.float32, noisy_dtype=None,
                 target_block_bytes=4 << 20):
        noisy_dtype = noisy_dtype or x_dtype
        kx, kn = jax.random.split(jax.random.fold_in(key, idx))
        x = jax.random.normal(kx, shape, dtype=jnp.float32).astype(x_dtype)
        noisy = jax.random.normal(kn, shape, dtype=jnp.float32).astype(noisy_dtype)

        # min_pallas_bytes=0 so the demo exercises the Pallas path even at
        # these small shapes.
        fn = jax.jit(
            functools.partial(
                smask,
                target_block_bytes=target_block_bytes,
                min_pallas_bytes=0,
            )
        )
        out = jax.block_until_ready(fn(x, noisy))

        out_dtype = jnp.result_type(x_dtype, noisy_dtype)
        ref = (jax.nn.sigmoid(x.astype(jnp.float32))
               * noisy.astype(jnp.float32)).astype(out_dtype)
        assert out.shape == shape, (out.shape, shape)
        assert out.dtype == out_dtype, (out.dtype, out_dtype)
        tol = 2e-2 if out_dtype == jnp.bfloat16 else 1e-5
        assert jnp.allclose(
            out.astype(jnp.float32), ref.astype(jnp.float32), atol=tol, rtol=tol
        ), f"mismatch in case {idx}"

    # 1) Module-consistent NCHW mask/noisy-spectrogram shape; megacore split
    #    keeps >= 2 grid blocks when possible.
    run_case(0, (2, 4, 16, 16))
    # 2) Multi-step grid with a masked partial edge block (rows=52, br=8).
    run_case(1, (2, 4, 52, 128), target_block_bytes=32 * 1024)
    # 3) bf16 in / bf16 out: sublane tile 16, aliased output.
    run_case(2, (2, 4, 52, 128), x_dtype=jnp.bfloat16, target_block_bytes=64 * 1024)
    # 4) Mixed dtypes (bf16 mask, f32 noisy): out=f32, alias onto noisy ({1:0}).
    run_case(3, (2, 4, 64, 128), x_dtype=jnp.bfloat16, noisy_dtype=jnp.float32,
             target_block_bytes=64 * 1024)
    # 5) Flat size not a multiple of 128 -> roofline-optimal fused-XLA fallback
    #    (no padding / concatenate pass).
    run_case(4, (1, 3, 40, 50))

    print("KERNEL_OK")
</pallas_src>

<mosaic_0001>
module attributes {stable_mosaic.version = 11 : i64} {
  func.func @_smask_kernel(%arg0: i32, %arg1: memref<8x256xf32, #tpu.memory_space<vmem>>, %arg2: memref<8x256xf32, #tpu.memory_space<vmem>>, %arg3: memref<8x256xf32, #tpu.memory_space<vmem>>) attributes {dimension_semantics = [#tpu.dimension_semantics<parallel>], iteration_bounds = array<i64: 1>, scalar_prefetch = 0 : i64, scratch_operands = 0 : i64, tpu.core_type = #tpu.core_type<tc>, window_params = [{transform_indices = @transform_0, window_bounds = array<i64: 8, 256>}, {transform_indices = @transform_1, window_bounds = array<i64: 8, 256>}, {transform_indices = @transform_2, window_bounds = array<i64: 8, 256>}]} {
    %c0 = arith.constant 0 : index
    %c0_0 = arith.constant 0 : index
    %0 = vector.load %arg1[%c0, %c0_0] : memref<8x256xf32, #tpu.memory_space<vmem>>, vector<8x256xf32>
    %c0_1 = arith.constant 0 : index
    %c0_2 = arith.constant 0 : index
    %1 = vector.load %arg2[%c0_1, %c0_2] : memref<8x256xf32, #tpu.memory_space<vmem>>, vector<8x256xf32>
    %2 = arith.negf %0 : vector<8x256xf32>
    %3 = math.exp %2 : vector<8x256xf32>
    %cst = arith.constant 1.000000e+00 : f32
    %4 = vector.broadcast %cst : f32 to vector<8x256xf32>
    %5 = arith.addf %4, %3 : vector<8x256xf32>
    %6 = arith.divf %4, %5 : vector<8x256xf32>
    %7 = arith.mulf %6, %1 : vector<8x256xf32>
    %c0_3 = arith.constant 0 : index
    %c0_4 = arith.constant 0 : index
    %8 = vector.load %arg3[%c0_3, %c0_4] : memref<8x256xf32, #tpu.memory_space<vmem>>, vector<8x256xf32>
    tpu.vector_store %arg3[%c0_3, %c0_4], %7 {strides = array<i32>} : memref<8x256xf32, #tpu.memory_space<vmem>>, vector<8x256xf32>,
    return
  }
  func.func @transform_0(%arg0: i32) -> (i32, i32) {
    %c0_i32 = arith.constant 0 : i32
    %c0_i32_0 = arith.constant 0 : i32
    return %arg0, %c0_i32 : i32, i32
  }
  func.func @transform_1(%arg0: i32) -> (i32, i32) {
    %c0_i32 = arith.constant 0 : i32
    %c0_i32_0 = arith.constant 0 : i32
    return %arg0, %c0_i32 : i32, i32
  }
  func.func @transform_2(%arg0: i32) -> (i32, i32) {
    %c0_i32 = arith.constant 0 : i32
    %c0_i32_0 = arith.constant 0 : i32
    return %arg0, %c0_i32 : i32, i32
  }
}

</mosaic_0001>

<bundles_post_ra>
// kernel: smask.1
= control target key start
LH: loop header
LB: loop body
LE: loop exit
PB: predicated region body
PF: predicated region fallthrough
CT: control target
= control target key end

     0   :  { %s78_s0 = inlined_call_operand.vmem [shape: f32[8,256], index: 0, kind: input, shape index: {}, may-alias: {0,2}]   ;;  %s79_s1 = inlined_call_operand.vmem [shape: f32[8,256], index: 1, kind: input, shape index: {}]   ;;  %s80_s2 = inlined_call_operand.vmem [shape: f32[8,256], index: 2, kind: output, shape index: {}, may-alias: {0,2}]  }
   0x1   :  { %v11_v0 = vld [vmem:[%s78_s0] sm:$0xff]  ;;  %v12_v1 = vld [vmem:[%s78_s0 + $0x8] sm:$0xff] }
   0x2   :  { %v35_v2 = vmul.f32 -1.442695, %v11_v0  ;;  %v36_v3 = vmul.f32 -1.442695, %v12_v1  ;;  %v13_v8 = vld [vmem:[%s79_s1] sm:$0xff]  ;;  %v14_v9 = vld [vmem:[%s79_s1 + $0x8] sm:$0xff] }
   0x4   :  { %37 = vpow2.f32 %v35_v2 }
   0x5   :  { %39 = vpow2.f32 %v36_v3 }
   0xe   :  { %v38_v4 = vpop.eup %37 }
   0xf   :  { %v40_v5 = vpop.eup %39  ;;  %v21_v6 = vadd.f32 1.0, %v38_v4 }
  0x10   :  { %v22_v7 = vadd.f32 1.0, %v40_v5 }
  0x11   :  { %41 = vrcp.f32 %v21_v6 }
  0x12   :  { %43 = vrcp.f32 %v22_v7 }
  0x1b   :  { %v42_v10 = vpop.eup %41 }
  0x1c   :  { %v44_v11 = vpop.eup %43  ;;  %v27_v12 = vmul.f32 %v42_v10, %v13_v8 }
  0x1d   :  { %v28_v13 = vmul.f32 %v44_v11, %v14_v9 }
  0x1e   :  { %29 = vst [vmem:[%s80_s2] sm:$0xff] %v27_v12 }
  0x1f   :  { %30 = vst [vmem:[%s80_s2 + $0x8] sm:$0xff] %v28_v13 }

</bundles_post_ra>
